<compile_context>
chip_gen: v6e
topology: v6e:2x2x1
jax: 0.10.0
libtpu: 0.0.40
codegen_flags: <defaults>
</compile_context>

<pallas_src>
import jax
import jax.numpy as jnp
from jax.experimental import pallas as pl
from jax.experimental.pallas import tpu as pltpu


_MAX_ROWS_TILE = 2048  # bounds the lane-padded (rows,1)->(rows,128) w/b blocks


def _round_up(a: int, b: int) -> int:
    return (a + b - 1) // b * b


def _sublane(dtype) -> int:
    # sublane packing: 8 rows for 32-bit, 16 for 16-bit, 32 for 8-bit dtypes
    return max(8, 32 // jnp.dtype(dtype).itemsize)


def _vmem_capacity_bytes() -> int:
    try:
        return int(pltpu.get_tpu_info().vmem_capacity_bytes)
    except Exception:
        pass
    try:
        kind = jax.devices()[0].device_kind.lower()
    except Exception:
        kind = ""
    if "v7" in kind:
        return 64 * 1024 * 1024        # per-TensorCore on v7x
    return 128 * 1024 * 1024           # v5e / v6e


def _compute_dtype(x_dtype):
    # bf16-native math is fine on v6e/v7x (bf16 VALU); v5e and unknown chips
    # must upcast to f32.
    if jnp.dtype(x_dtype) == jnp.dtype(jnp.bfloat16):
        try:
            kind = jax.devices()[0].device_kind.lower()
        except Exception:
            kind = ""
        if ("v6" in kind) or ("v7" in kind):
            return jnp.bfloat16
    return jnp.float32


def _affine2d_kernel(x_ref, w_ref, b_ref, o_ref):
    # x_ref/o_ref: VMEM (rows_tile, cols_tile)
    # w_ref/b_ref: VMEM (rows_tile, 1), compute dtype, broadcast over lanes.
    x = x_ref[...].astype(w_ref.dtype)
    o_ref[...] = (x * w_ref[...] + b_ref[...]).astype(o_ref.dtype)


def affine2d(x: jax.Array, weight: jax.Array, bias: jax.Array,
             *, target_block_bytes: int | None = None,
             donate_x: bool = False) -> jax.Array:
    """y = x * weight + bias with per-channel weight/bias.

    x:      (N, C, H, W)
    weight: any shape with C elements (e.g. PyTorch's (1, C, 1, 1))
    bias:   any shape with C elements
    """
    N, C, H, W = x.shape
    R, cols = N * C, H * W
    itemsize = jnp.dtype(x.dtype).itemsize
    sub = _sublane(x.dtype)

    param_dtype = _compute_dtype(x.dtype)
    param_itemsize = jnp.dtype(param_dtype).itemsize

    vmem_cap = _vmem_capacity_bytes()
    vmem_ceiling = (vmem_cap * 3) // 4          # ~48 MiB on v7x, ~96 MiB v5e/v6e
    if target_block_bytes is None:
        # in + out, each double-buffered => ~4 resident x blocks, plus w/b and
        # compiler scratch headroom.
        target_block_bytes = min(16 * 1024 * 1024,
                                 max(1 << 20, vmem_ceiling // 6))

    # Lane-dense 2D view: one row per (n, c) spatial plane.
    x2 = x.reshape(R, cols)

    # Per-row scale/shift (tiny: N*C elements each) in the compute dtype.
    w_rows = jnp.broadcast_to(
        weight.reshape(1, C).astype(param_dtype), (N, C)).reshape(R, 1)
    b_rows = jnp.broadcast_to(
        bias.reshape(1, C).astype(param_dtype), (N, C)).reshape(R, 1)

    # --- tile sizing: keep the x block ~= target_block_bytes ----------------
    if cols * itemsize > target_block_bytes:
        # Very long rows: one sublane group of rows, lane-capped columns.
        rows_tile = R if R < sub else sub
        cols_tile = max(
            128,
            (target_block_bytes // (max(rows_tile, 1) * itemsize)) // 128 * 128)
    else:
        cols_tile = cols                                   # full last dim
        rows_per = max(1, target_block_bytes // (cols * itemsize))
        rows_tile = min(R, rows_per, _MAX_ROWS_TILE)
        if rows_tile < R:
            rows_tile = max(sub, (rows_tile // sub) * sub)  # sublane multiple

    grid_rows = pl.cdiv(R, rows_tile)
    grid_cols = pl.cdiv(cols, cols_tile)

    # Never collapse to a single block: keep several row blocks where possible
    # so both v7x TensorCores get work and DMA/compute overlap exists.
    if grid_rows * grid_cols == 1 and R > sub:
        rows_tile = min(R, max(sub, _round_up(pl.cdiv(R, 4), sub)))
        grid_rows = pl.cdiv(R, rows_tile)

    grid = (grid_rows, grid_cols)

    # --- VMEM budget (explicitly includes lane-padded w/b blocks) -----------
    x_block_bytes = rows_tile * cols_tile * itemsize
    wb_block_bytes = _round_up(rows_tile, 8) * 128 * param_itemsize
    vmem_needed = 4 * x_block_bytes + 4 * wb_block_bytes + (4 << 20)
    vmem_limit = int(min(vmem_ceiling, max(32 * 1024 * 1024, vmem_needed)))

    extra_kwargs = {}
    if donate_x:
        extra_kwargs["input_output_aliases"] = {0: 0}

    out2 = pl.pallas_call(
        _affine2d_kernel,
        out_shape=jax.ShapeDtypeStruct((R, cols), x.dtype),
        grid=grid,
        in_specs=[
            pl.BlockSpec((rows_tile, cols_tile), lambda i, j: (i, j)),  # x
            pl.BlockSpec((rows_tile, 1), lambda i, j: (i, 0)),          # weight
            pl.BlockSpec((rows_tile, 1), lambda i, j: (i, 0)),          # bias
        ],
        out_specs=pl.BlockSpec((rows_tile, cols_tile), lambda i, j: (i, j)),
        compiler_params=pltpu.CompilerParams(
            dimension_semantics=("parallel", "parallel"),
            vmem_limit_bytes=vmem_limit,
        ),
        **extra_kwargs,
    )(x2, w_rows, b_rows)

    return out2.reshape(N, C, H, W)


if __name__ == "__main__":
    key = jax.random.PRNGKey(0)
    init_w = 0.1

    # --- primary check: module-sized f32 input -----------------------------
    N, C, H, W = 2, 4, 16, 16
    weight = jnp.full((1, C, 1, 1), init_w, dtype=jnp.float32)
    bias = jnp.zeros((1, C, 1, 1), dtype=jnp.float32)
    x = jax.random.normal(key, (N, C, H, W), dtype=jnp.float32)

    y = jax.block_until_ready(affine2d(x, weight, bias))
    y_ref = x * weight + bias
    assert y.shape == x.shape
    assert jnp.allclose(y, y_ref, atol=1e-6, rtol=1e-6), "f32 mismatch vs reference"

    # --- secondary check: larger shape exercises the multi-block grid ------
    key2, key3 = jax.random.split(key)
    N2, C2, H2, W2 = 2, 64, 64, 64
    w2 = jnp.full((1, C2, 1, 1), init_w, dtype=jnp.float32)
    b2 = jax.random.normal(key3, (1, C2, 1, 1), dtype=jnp.float32)
    x2 = jax.random.normal(key2, (N2, C2, H2, W2), dtype=jnp.float32)

    y2 = jax.block_until_ready(affine2d(x2, w2, b2))
    y2_ref = x2 * w2 + b2
    assert jnp.allclose(y2, y2_ref, atol=1e-6, rtol=1e-6), "f32 multi-block mismatch"

    # --- bf16 path (native bf16 math on v6e/v7x, f32 upcast elsewhere) -----
    xb = x.astype(jnp.bfloat16)
    yb = jax.block_until_ready(affine2d(xb, weight, bias))
    yb_ref = (xb.astype(jnp.float32) * weight + bias)
    assert yb.dtype == jnp.bfloat16
    assert jnp.allclose(yb.astype(jnp.float32), yb_ref, atol=2e-2, rtol=2e-2), \
        "bf16 mismatch vs reference"

    print("KERNEL_OK")
</pallas_src>

<mosaic_0001>
module attributes {stable_mosaic.version = 11 : i64} {
  func.func @_affine2d_kernel(%arg0: i32, %arg1: i32, %arg2: memref<8x256xf32, #tpu.memory_space<vmem>>, %arg3: memref<8x1xf32, #tpu.memory_space<vmem>>, %arg4: memref<8x1xf32, #tpu.memory_space<vmem>>, %arg5: memref<8x256xf32, #tpu.memory_space<vmem>>) attributes {dimension_semantics = [#tpu.dimension_semantics<parallel>, #tpu.dimension_semantics<parallel>], iteration_bounds = array<i64: 1, 1>, scalar_prefetch = 0 : i64, scratch_operands = 0 : i64, tpu.core_type = #tpu.core_type<tc>, window_params = [{transform_indices = @transform_0, window_bounds = array<i64: 8, 256>}, {transform_indices = @transform_1, window_bounds = array<i64: 8, 1>}, {transform_indices = @transform_2, window_bounds = array<i64: 8, 1>}, {transform_indices = @transform_3, window_bounds = array<i64: 8, 256>}]} {
    %c0 = arith.constant 0 : index
    %c0_0 = arith.constant 0 : index
    %0 = vector.load %arg2[%c0, %c0_0] : memref<8x256xf32, #tpu.memory_space<vmem>>, vector<8x256xf32>
    %c0_1 = arith.constant 0 : index
    %c0_2 = arith.constant 0 : index
    %1 = vector.load %arg3[%c0_1, %c0_2] : memref<8x1xf32, #tpu.memory_space<vmem>>, vector<8x1xf32>
    %2 = vector.broadcast %1 : vector<8x1xf32> to vector<8x256xf32>
    %3 = arith.mulf %0, %2 : vector<8x256xf32>
    %c0_3 = arith.constant 0 : index
    %c0_4 = arith.constant 0 : index
    %4 = vector.load %arg4[%c0_3, %c0_4] : memref<8x1xf32, #tpu.memory_space<vmem>>, vector<8x1xf32>
    %5 = vector.broadcast %4 : vector<8x1xf32> to vector<8x256xf32>
    %6 = arith.addf %3, %5 : vector<8x256xf32>
    %c0_5 = arith.constant 0 : index
    %c0_6 = arith.constant 0 : index
    %7 = vector.load %arg5[%c0_5, %c0_6] : memref<8x256xf32, #tpu.memory_space<vmem>>, vector<8x256xf32>
    tpu.vector_store %arg5[%c0_5, %c0_6], %6 {strides = array<i32>} : memref<8x256xf32, #tpu.memory_space<vmem>>, vector<8x256xf32>,
    return
  }
  func.func @transform_0(%arg0: i32, %arg1: i32) -> (i32, i32) {
    %c0_i32 = arith.constant 0 : i32
    return %arg0, %arg1 : i32, i32
  }
  func.func @transform_1(%arg0: i32, %arg1: i32) -> (i32, i32) {
    %c0_i32 = arith.constant 0 : i32
    %c0_i32_0 = arith.constant 0 : i32
    return %arg0, %c0_i32 : i32, i32
  }
  func.func @transform_2(%arg0: i32, %arg1: i32) -> (i32, i32) {
    %c0_i32 = arith.constant 0 : i32
    %c0_i32_0 = arith.constant 0 : i32
    return %arg0, %c0_i32 : i32, i32
  }
  func.func @transform_3(%arg0: i32, %arg1: i32) -> (i32, i32) {
    %c0_i32 = arith.constant 0 : i32
    return %arg0, %arg1 : i32, i32
  }
}

</mosaic_0001>

<bundles_post_ra>
// kernel: tpu_custom_call.1
= control target key start
LH: loop header
LB: loop body
LE: loop exit
PB: predicated region body
PF: predicated region fallthrough
CT: control target
= control target key end

     0   :  { %v74_v1 = vmov 0   ;;  %s111_s0 = inlined_call_operand.vmem [shape: f32[8,256], index: 0, kind: input, shape index: {}]   ;;  %s112_s1 = inlined_call_operand.vmem [shape: f32[8,1], index: 1, kind: input, shape index: {}]   ;;  %s113_s2 = inlined_call_operand.vmem [shape: f32[8,1], index: 2, kind: input, shape index: {}]   ;;  %s114_s3 = inlined_call_operand.hbm [shape: f32[8,256], index: 3, kind: output, shape index: {}]  }
   0x1   :  { %v17_v0 = vld [vmem:[%s112_s1] sm:$0xff]  ;;  %51 = vset.pattern.permute.xlu0 %v74_v1 }
   0x2   :  { %8 = vsyncpa [#allocation3], 0  ;;  %20 = vperm.xlu0 %51, %v17_v0   ;;  %v25_v2 = vld [vmem:[%s113_s2] sm:$0xff]  ;;  %v16_v5 = vld [vmem:[%s111_s0 + $0x8] sm:$0xff]  ;;  %s75_s20 = smov [#allocation2]  }
   0x3   :  { %v15_v4 = vld [vmem:[%s111_s0] sm:$0xff]  ;;  %s41_s1 = sshll.u32 %s75_s20, 4  ;;  %s42_s1 = int_to_ptr.vmem [resolvable:$true] %s41_s1 }
   0x4   :  { %s52_s2 = scalar_lea.vmem %s42_s1, 256  ;;  %p57_p1 = scmp.lt.s32.totalorder %s42_s1, %s42_s1 }
   0x5   :  { %p53_p0 = scmp.ne.s32.totalorder %s42_s1, %s52_s2  ;;  %p58_p2 = scmp.lt.s32.totalorder %s52_s2, %s52_s2 }
   0x6   :  { %28 = vperm.xlu0 %51, %v25_v2  }
   0x7   :  { %p59_p3 = por %p58_p2, %p57_p1 }
   0x9   :  { %p60_p4 = pnand %p59_p3, %p53_p0 }
  0x7d   :  { %v21_v3 = vpop.permute.xlu0 %20 }
  0x7e   :  { %v23_v6 = vmul.f32 %v21_v3, %v15_v4  ;;  %v24_v7 = vmul.f32 %v21_v3, %v16_v5 }
  0x81   :  { %v29_v8 = vpop.permute.xlu0 %28 }
  0x82   :  { %v31_v9 = vadd.f32 %v29_v8, %v23_v6  ;;  %v32_v10 = vadd.f32 %v29_v8, %v24_v7 }
  0x84   :  { %33 = vst [vmem:[#allocation2] sm:$0xff] %v31_v9  ;;  %34 = vst [vmem:[#allocation2 + $0x8] sm:$0xff] %v32_v10 }
  0x85   :  { %63 = shalt.err (!%p60_p4)
}
  0x86   :  { %44 = dma.vmem_to_hbm [thread:$0]  %s42_s1, 256, %s114_s3, [#allocation3]  }
  0x87   :  { %72 = dma.done.wait [#allocation3], 256  }
  0x88   :  { %73 = vsyncadd [#allocation3], 4294967040 }
  0x89   :  { %48 = vsyncpa [#allocation3], 1 }

</bundles_post_ra>
